<compile_context>
chip_gen: v5e
topology: v5e:2x2
jax: 0.10.0
libtpu: 0.0.40
codegen_flags: <defaults>
</compile_context>

<pallas_src>
import functools
import math

import jax
import jax.numpy as jnp
from jax import lax
from jax.experimental import pallas as pl
from jax.experimental.pallas import tpu as pltpu


_LANE = 128


def _gelu_exact(x):
    # PyTorch F.gelu default (approximate='none'): 0.5*x*(1+erf(x/sqrt(2)))
    return 0.5 * x * (1.0 + lax.erf(x * (1.0 / math.sqrt(2.0))))


def _pool_mlp_kernel(x_ref, w1_ref, b1_ref, w2_ref, b2_ref, w3_ref, b3_ref,
                     weight_ref, acc_ref, *, true_s, n_steps):
    """Streaming global-average-pool + MLP head + sigmoid.

    grid = (B, S_tiles).  Per S-tile: one whole-block f32 add into the
    full-tile-width VMEM accumulator (pure VPU, no serial chain, no cross-lane
    work).  Only the last S step does the cross-lane reduce, 1/S scale, the
    tiny 3-layer MLP and the sigmoid (pl.when epilogue).
    """
    step = pl.program_id(1)
    tile_s = x_ref.shape[-1]
    # Valid lanes in the last (possibly ragged / partially out-of-bounds) tile.
    tail = true_s - (n_steps - 1) * tile_s      # static Python int, 0 < tail <= tile_s
    inv_s = 1.0 / float(true_s)

    @pl.when(step == 0)
    def _():
        acc_ref[...] = jnp.zeros_like(acc_ref)

    def _add(mask_tail):
        chunk = x_ref[...].astype(jnp.float32)
        if mask_tail:
            # Boundary block: lanes >= tail are out-of-bounds garbage -> zero them.
            lane = lax.broadcasted_iota(jnp.int32, chunk.shape, 2)
            chunk = jnp.where(lane < tail, chunk, 0.0)
        acc_ref[...] = acc_ref[...] + chunk

    if tail == tile_s:
        # S divides evenly into tiles: never any masking in the hot loop.
        _add(False)
    else:
        @pl.when(step < n_steps - 1)
        def _():
            _add(False)

        @pl.when(step == n_steps - 1)
        def _():
            _add(True)

    @pl.when(step == n_steps - 1)
    def _():
        pooled = jnp.sum(acc_ref[...], axis=-1) * inv_s          # (1, C) f32
        h = jnp.dot(pooled, w1_ref[...], preferred_element_type=jnp.float32) + b1_ref[...]
        h = _gelu_exact(h)
        h = jnp.dot(h, w2_ref[...], preferred_element_type=jnp.float32) + b2_ref[...]
        h = _gelu_exact(h)
        h = jnp.dot(h, w3_ref[...], preferred_element_type=jnp.float32) + b3_ref[...]
        w = jax.nn.sigmoid(h)
        weight_ref[...] = w.reshape(weight_ref.shape).astype(weight_ref.dtype)


def _pick_tile_s(S, C, vmem_tile_bytes):
    """Largest lane-dense (multiple-of-128) S tile; sized against the f32
    accumulator so the VMEM footprint is bounded regardless of x dtype."""
    vmem_tile_bytes = min(int(vmem_tile_bytes), 12 * 1024 * 1024)   # v7x-safe cap
    lanes = (vmem_tile_bytes // (C * 4)) // _LANE * _LANE
    lanes = max(_LANE, lanes)
    s_pad = -(-S // _LANE) * _LANE                                  # round S up to 128
    return min(lanes, s_pad)


def channel_wise_attention(x, params, *, vmem_tile_bytes=8 * 1024 * 1024):
    """x: (B, C, D, H, W).  Returns (feature (B,C,D,H,W), weight (B,C,1,1,1))."""
    w1, b1, w2, b2, w3, b3 = params
    B, C, D, H, W = x.shape
    C4 = w1.shape[1]
    S = D * H * W
    x_flat = x.reshape(B, C, S)
    itemsize = x.dtype.itemsize

    TILE_S = _pick_tile_s(S, C, vmem_tile_bytes)
    n_s = pl.cdiv(S, TILE_S)

    # Explicit VMEM budget: 2x double-buffered input tile + f32 accumulator
    # + small params/output + margin.  Keeps v5e's 16 MiB scoped default from
    # biting and stays well under v7x's 64 MiB physical VMEM.
    tile_in_bytes = C * TILE_S * itemsize
    acc_bytes = C * TILE_S * 4
    vmem_limit = 2 * tile_in_bytes + acc_bytes + (4 << 20)
    vmem_limit = int(min(max(vmem_limit, 16 << 20), 48 << 20))

    bytes_x = B * C * S * itemsize
    mlp_flops = 2 * B * (C * C4 + C4 * C4 + C4 * C)

    # TODO(synk): on v7x with B == 1, split the S axis across the two
    # TensorCores (partial accumulators + trivial combine) for ~2x on pass 1.
    weight = pl.pallas_call(
        functools.partial(_pool_mlp_kernel, true_s=S, n_steps=n_s),
        out_shape=jax.ShapeDtypeStruct((B, 1, C), x.dtype),
        grid_spec=pltpu.PrefetchScalarGridSpec(
            num_scalar_prefetch=0,
            grid=(B, n_s),
            in_specs=[
                pl.BlockSpec((1, C, TILE_S), lambda b, i: (b, 0, i)),
                pl.BlockSpec((C, C4), lambda b, i: (0, 0)),
                pl.BlockSpec((1, C4), lambda b, i: (0, 0)),
                pl.BlockSpec((C4, C4), lambda b, i: (0, 0)),
                pl.BlockSpec((1, C4), lambda b, i: (0, 0)),
                pl.BlockSpec((C4, C), lambda b, i: (0, 0)),
                pl.BlockSpec((1, C), lambda b, i: (0, 0)),
            ],
            out_specs=pl.BlockSpec((1, 1, C), lambda b, i: (b, 0, 0)),
            scratch_shapes=[pltpu.VMEM((1, C, TILE_S), jnp.float32)],
        ),
        compiler_params=pltpu.CompilerParams(
            dimension_semantics=("parallel", "arbitrary"),
            vmem_limit_bytes=vmem_limit),
        cost_estimate=pl.CostEstimate(
            flops=B * C * S + mlp_flops,
            transcendentals=B * (2 * C4 + C),
            bytes_accessed=bytes_x + B * C * itemsize),
    )(x_flat, w1, b1.reshape(1, -1), w2, b2.reshape(1, -1), w3, b3.reshape(1, -1))

    weight5 = weight.reshape(B, C, 1, 1, 1)
    # Pure broadcast -- no Pallas pass, no extra HBM read; XLA can fuse this
    # into the consumer instead of materializing it.
    feature = jnp.broadcast_to(weight5, x.shape)
    return feature, weight5


def init_params(key, in_channels):
    """Deterministic init mimicking nn.Linear (uniform +-1/sqrt(fan_in)).

    Weights are stored as (in, out) so the kernel can do x @ W directly.
    """
    c, c4 = in_channels, in_channels // 4
    ks = jax.random.split(key, 6)

    def lin(kw, kb, fan_in, fan_out):
        bound = 1.0 / math.sqrt(fan_in)
        w = jax.random.uniform(kw, (fan_in, fan_out), jnp.float32, -bound, bound)
        b = jax.random.uniform(kb, (fan_out,), jnp.float32, -bound, bound)
        return w, b

    w1, b1 = lin(ks[0], ks[1], c, c4)
    w2, b2 = lin(ks[2], ks[3], c4, c4)
    w3, b3 = lin(ks[4], ks[5], c4, c)
    return (w1, b1, w2, b2, w3, b3)


def _reference(x, params):
    w1, b1, w2, b2, w3, b3 = params
    B, C = x.shape[:2]
    pooled = jnp.mean(x, axis=(2, 3, 4))                     # (B, C)
    h = _gelu_exact(pooled @ w1 + b1)
    h = _gelu_exact(h @ w2 + b2)
    w = jax.nn.sigmoid(h @ w3 + b3)
    weight = w.reshape(B, C, 1, 1, 1)
    feature = jnp.broadcast_to(weight, x.shape)
    return feature, weight


if __name__ == "__main__":
    key = jax.random.PRNGKey(0)
    k_x, k_p = jax.random.split(key)

    B, C = 2, 32                       # in_channels=32 (module default)
    params = init_params(k_p, C)

    # (D, H, W), vmem_tile_bytes -- exercises:
    #   single big tile / multi-step even grid / ragged (masked) last S tile /
    #   single partially-out-of-bounds boundary tile (S < 128) / larger S.
    configs = [
        ((4, 16, 16), 8 * 1024 * 1024),   # S=1024, TILE_S=1024 -> 1 S-step
        ((4, 16, 16), 32 * 1024),         # S=1024, TILE_S=256  -> 4 S-steps
        ((5, 8, 16), 32 * 1024),          # S=640,  TILE_S=256  -> ragged last tile
        ((3, 5, 7), 8 * 1024 * 1024),     # S=105,  TILE_S=128  -> masked boundary block
        ((16, 16, 16), 8 * 1024 * 1024),  # S=4096, TILE_S=4096 -> big single tile
    ]

    for (D, H, W), tile_bytes in configs:
        kx = jax.random.fold_in(k_x, D * H * W)
        x = jax.random.normal(kx, (B, C, D, H, W), dtype=jnp.float32)

        feature, weight = channel_wise_attention(x, params,
                                                 vmem_tile_bytes=tile_bytes)
        jax.block_until_ready((feature, weight))

        feat_ref, w_ref = _reference(x, params)
        assert feature.shape == x.shape and weight.shape == (B, C, 1, 1, 1)
        assert jnp.allclose(weight, w_ref, atol=1e-5, rtol=1e-5)
        assert jnp.allclose(feature, feat_ref, atol=1e-5, rtol=1e-5)

    print("KERNEL_OK")
</pallas_src>

<mosaic_0001>
module attributes {stable_mosaic.version = 11 : i64} {
  func.func @_pool_mlp_kernel(%arg0: i32, %arg1: i32, %arg2: memref<1x32x1024xf32, #tpu.memory_space<vmem>>, %arg3: memref<32x8xf32, #tpu.memory_space<vmem>>, %arg4: memref<1x8xf32, #tpu.memory_space<vmem>>, %arg5: memref<8x8xf32, #tpu.memory_space<vmem>>, %arg6: memref<1x8xf32, #tpu.memory_space<vmem>>, %arg7: memref<8x32xf32, #tpu.memory_space<vmem>>, %arg8: memref<1x32xf32, #tpu.memory_space<vmem>>, %arg9: memref<1x1x32xf32, #tpu.memory_space<vmem>>, %arg10: memref<1x32x1024xf32, #tpu.memory_space<vmem>>) attributes {dimension_semantics = [#tpu.dimension_semantics<parallel>, #tpu.dimension_semantics<arbitrary>], iteration_bounds = array<i64: 2, 1>, scalar_prefetch = 0 : i64, scratch_operands = 1 : i64, tpu.core_type = #tpu.core_type<tc>, window_params = [{transform_indices = @transform_0, window_bounds = array<i64: 1, 32, 1024>}, {pipeline_mode = #tpu.pipeline_mode<synchronous>, transform_indices = @transform_1, window_bounds = array<i64: 32, 8>}, {pipeline_mode = #tpu.pipeline_mode<synchronous>, transform_indices = @transform_2, window_bounds = array<i64: 1, 8>}, {pipeline_mode = #tpu.pipeline_mode<synchronous>, transform_indices = @transform_3, window_bounds = array<i64: 8, 8>}, {pipeline_mode = #tpu.pipeline_mode<synchronous>, transform_indices = @transform_4, window_bounds = array<i64: 1, 8>}, {pipeline_mode = #tpu.pipeline_mode<synchronous>, transform_indices = @transform_5, window_bounds = array<i64: 8, 32>}, {pipeline_mode = #tpu.pipeline_mode<synchronous>, transform_indices = @transform_6, window_bounds = array<i64: 1, 32>}, {transform_indices = @transform_7, window_bounds = array<i64: 1, 1, 32>}]} {
    %c0_i32 = arith.constant 0 : i32
    %0 = arith.cmpi eq, %arg1, %c0_i32 : i32
    %1 = arith.extui %0 : i1 to i32
    %c0_i32_0 = arith.constant 0 : i32
    %2 = arith.cmpi ne, %1, %c0_i32_0 : i32
    scf.if %2 {
      %cst = arith.constant 0.000000e+00 : f32
      %10 = vector.broadcast %cst : f32 to vector<1x32x1024xf32>
      %c0_11 = arith.constant 0 : index
      %c0_12 = arith.constant 0 : index
      %c0_13 = arith.constant 0 : index
      %11 = vector.load %arg10[%c0_11, %c0_12, %c0_13] : memref<1x32x1024xf32, #tpu.memory_space<vmem>>, vector<1x32x1024xf32>
      tpu.vector_store %arg10[%c0_11, %c0_12, %c0_13], %10 {strides = array<i32>} : memref<1x32x1024xf32, #tpu.memory_space<vmem>>, vector<1x32x1024xf32>,
    } else {
    }
    %c0 = arith.constant 0 : index
    %c0_1 = arith.constant 0 : index
    %c0_2 = arith.constant 0 : index
    %3 = vector.load %arg2[%c0, %c0_1, %c0_2] : memref<1x32x1024xf32, #tpu.memory_space<vmem>>, vector<1x32x1024xf32>
    %c0_3 = arith.constant 0 : index
    %c0_4 = arith.constant 0 : index
    %c0_5 = arith.constant 0 : index
    %4 = vector.load %arg10[%c0_3, %c0_4, %c0_5] : memref<1x32x1024xf32, #tpu.memory_space<vmem>>, vector<1x32x1024xf32>
    %5 = arith.addf %4, %3 : vector<1x32x1024xf32>
    %c0_6 = arith.constant 0 : index
    %c0_7 = arith.constant 0 : index
    %c0_8 = arith.constant 0 : index
    %6 = vector.load %arg10[%c0_6, %c0_7, %c0_8] : memref<1x32x1024xf32, #tpu.memory_space<vmem>>, vector<1x32x1024xf32>
    tpu.vector_store %arg10[%c0_6, %c0_7, %c0_8], %5 {strides = array<i32>} : memref<1x32x1024xf32, #tpu.memory_space<vmem>>, vector<1x32x1024xf32>,
    %c0_i32_9 = arith.constant 0 : i32
    %7 = arith.cmpi eq, %arg1, %c0_i32_9 : i32
    %8 = arith.extui %7 : i1 to i32
    %c0_i32_10 = arith.constant 0 : i32
    %9 = arith.cmpi ne, %8, %c0_i32_10 : i32
    scf.if %9 {
      %c0_11 = arith.constant 0 : index
      %c0_12 = arith.constant 0 : index
      %c0_13 = arith.constant 0 : index
      %10 = vector.load %arg10[%c0_11, %c0_12, %c0_13] : memref<1x32x1024xf32, #tpu.memory_space<vmem>>, vector<1x32x1024xf32>
      %cst = arith.constant dense<0.000000e+00> : vector<1x32xf32>
      %11 = vector.multi_reduction <add>, %10, %cst [2] : vector<1x32x1024xf32> to vector<1x32xf32>
      %cst_14 = arith.constant 9.765625E-4 : f32
      %12 = vector.broadcast %cst_14 : f32 to vector<1x32xf32>
      %13 = arith.mulf %11, %12 : vector<1x32xf32>
      %c0_15 = arith.constant 0 : index
      %c0_16 = arith.constant 0 : index
      %14 = vector.load %arg3[%c0_15, %c0_16] : memref<32x8xf32, #tpu.memory_space<vmem>>, vector<32x8xf32>
      %cst_17 = arith.constant dense<0.000000e+00> : vector<1x8xf32>
      %15 = tpu.matmul %13, %14, %cst_17 {dimension_numbers = #tpu.dot_dimension_numbers<[1], [0], [0], [1], [0, 0, 1, 1], [], []>} : vector<1x32xf32>, vector<32x8xf32>, vector<1x8xf32> -> vector<1x8xf32>
      %c0_18 = arith.constant 0 : index
      %c0_19 = arith.constant 0 : index
      %16 = vector.load %arg4[%c0_18, %c0_19] : memref<1x8xf32, #tpu.memory_space<vmem>>, vector<1x8xf32>
      %17 = arith.addf %15, %16 : vector<1x8xf32>
      %cst_20 = arith.constant 5.000000e-01 : f32
      %18 = vector.broadcast %cst_20 : f32 to vector<1x8xf32>
      %19 = arith.mulf %18, %17 : vector<1x8xf32>
      %cst_21 = arith.constant 0.707106769 : f32
      %20 = vector.broadcast %cst_21 : f32 to vector<1x8xf32>
      %21 = arith.mulf %17, %20 : vector<1x8xf32>
      %22 = math.erf %21 : vector<1x8xf32>
      %cst_22 = arith.constant 1.000000e+00 : f32
      %23 = vector.broadcast %cst_22 : f32 to vector<1x8xf32>
      %24 = arith.addf %23, %22 : vector<1x8xf32>
      %25 = arith.mulf %19, %24 : vector<1x8xf32>
      %c0_23 = arith.constant 0 : index
      %c0_24 = arith.constant 0 : index
      %26 = vector.load %arg5[%c0_23, %c0_24] : memref<8x8xf32, #tpu.memory_space<vmem>>, vector<8x8xf32>
      %cst_25 = arith.constant dense<0.000000e+00> : vector<1x8xf32>
      %27 = tpu.matmul %25, %26, %cst_25 {dimension_numbers = #tpu.dot_dimension_numbers<[1], [0], [0], [1], [0, 0, 1, 1], [], []>} : vector<1x8xf32>, vector<8x8xf32>, vector<1x8xf32> -> vector<1x8xf32>
      %c0_26 = arith.constant 0 : index
      %c0_27 = arith.constant 0 : index
      %28 = vector.load %arg6[%c0_26, %c0_27] : memref<1x8xf32, #tpu.memory_space<vmem>>, vector<1x8xf32>
      %29 = arith.addf %27, %28 : vector<1x8xf32>
      %cst_28 = arith.constant 5.000000e-01 : f32
      %30 = vector.broadcast %cst_28 : f32 to vector<1x8xf32>
      %31 = arith.mulf %30, %29 : vector<1x8xf32>
      %cst_29 = arith.constant 0.707106769 : f32
      %32 = vector.broadcast %cst_29 : f32 to vector<1x8xf32>
      %33 = arith.mulf %29, %32 : vector<1x8xf32>
      %34 = math.erf %33 : vector<1x8xf32>
      %cst_30 = arith.constant 1.000000e+00 : f32
      %35 = vector.broadcast %cst_30 : f32 to vector<1x8xf32>
      %36 = arith.addf %35, %34 : vector<1x8xf32>
      %37 = arith.mulf %31, %36 : vector<1x8xf32>
      %c0_31 = arith.constant 0 : index
      %c0_32 = arith.constant 0 : index
      %38 = vector.load %arg7[%c0_31, %c0_32] : memref<8x32xf32, #tpu.memory_space<vmem>>, vector<8x32xf32>
      %cst_33 = arith.constant dense<0.000000e+00> : vector<1x32xf32>
      %39 = tpu.matmul %37, %38, %cst_33 {dimension_numbers = #tpu.dot_dimension_numbers<[1], [0], [0], [1], [0, 0, 1, 1], [], []>} : vector<1x8xf32>, vector<8x32xf32>, vector<1x32xf32> -> vector<1x32xf32>
      %c0_34 = arith.constant 0 : index
      %c0_35 = arith.constant 0 : index
      %40 = vector.load %arg8[%c0_34, %c0_35] : memref<1x32xf32, #tpu.memory_space<vmem>>, vector<1x32xf32>
      %41 = arith.addf %39, %40 : vector<1x32xf32>
      %42 = arith.negf %41 : vector<1x32xf32>
      %43 = math.exp %42 : vector<1x32xf32>
      %cst_36 = arith.constant 1.000000e+00 : f32
      %44 = vector.broadcast %cst_36 : f32 to vector<1x32xf32>
      %45 = arith.addf %44, %43 : vector<1x32xf32>
      %46 = arith.divf %44, %45 : vector<1x32xf32>
      %47 = vector.shape_cast %46 : vector<1x32xf32> to vector<1x1x32xf32>
      %c0_37 = arith.constant 0 : index
      %c0_38 = arith.constant 0 : index
      %c0_39 = arith.constant 0 : index
      %48 = vector.load %arg9[%c0_37, %c0_38, %c0_39] : memref<1x1x32xf32, #tpu.memory_space<vmem>>, vector<1x1x32xf32>
      tpu.vector_store %arg9[%c0_37, %c0_38, %c0_39], %47 {strides = array<i32>} : memref<1x1x32xf32, #tpu.memory_space<vmem>>, vector<1x1x32xf32>,
    } else {
    }
    return
  }
  func.func @transform_0(%arg0: i32, %arg1: i32) -> (i32, i32, i32) {
    %c0_i32 = arith.constant 0 : i32
    %c0_i32_0 = arith.constant 0 : i32
    return %arg0, %c0_i32, %arg1 : i32, i32, i32
  }
  func.func @transform_1(%arg0: i32, %arg1: i32) -> (i32, i32) {
    %c0_i32 = arith.constant 0 : i32
    %c0_i32_0 = arith.constant 0 : i32
    %c0_i32_1 = arith.constant 0 : i32
    return %c0_i32, %c0_i32_0 : i32, i32
  }
  func.func @transform_2(%arg0: i32, %arg1: i32) -> (i32, i32) {
    %c0_i32 = arith.constant 0 : i32
    %c0_i32_0 = arith.constant 0 : i32
    %c0_i32_1 = arith.constant 0 : i32
    return %c0_i32, %c0_i32_0 : i32, i32
  }
  func.func @transform_3(%arg0: i32, %arg1: i32) -> (i32, i32) {
    %c0_i32 = arith.constant 0 : i32
    %c0_i32_0 = arith.constant 0 : i32
    %c0_i32_1 = arith.constant 0 : i32
    return %c0_i32, %c0_i32_0 : i32, i32
  }
  func.func @transform_4(%arg0: i32, %arg1: i32) -> (i32, i32) {
    %c0_i32 = arith.constant 0 : i32
    %c0_i32_0 = arith.constant 0 : i32
    %c0_i32_1 = arith.constant 0 : i32
    return %c0_i32, %c0_i32_0 : i32, i32
  }
  func.func @transform_5(%arg0: i32, %arg1: i32) -> (i32, i32) {
    %c0_i32 = arith.constant 0 : i32
    %c0_i32_0 = arith.constant 0 : i32
    %c0_i32_1 = arith.constant 0 : i32
    return %c0_i32, %c0_i32_0 : i32, i32
  }
  func.func @transform_6(%arg0: i32, %arg1: i32) -> (i32, i32) {
    %c0_i32 = arith.constant 0 : i32
    %c0_i32_0 = arith.constant 0 : i32
    %c0_i32_1 = arith.constant 0 : i32
    return %c0_i32, %c0_i32_0 : i32, i32
  }
  func.func @transform_7(%arg0: i32, %arg1: i32) -> (i32, i32, i32) {
    %c0_i32 = arith.constant 0 : i32
    %c0_i32_0 = arith.constant 0 : i32
    %c0_i32_1 = arith.constant 0 : i32
    return %arg0, %c0_i32, %c0_i32_0 : i32, i32, i32
  }
}

</mosaic_0001>

<bundles_post_ra>
// kernel: tpu_custom_call.1
= control target key start
LH: loop header
LB: loop body
LE: loop exit
PB: predicated region body
PF: predicated region fallthrough
CT: control target
= control target key end

     0   :  { %12 = vsyncpa [#allocation4], 0  ;;  %s1281_s0 = inlined_call_operand.hbm [shape: f32[2,32,1024], index: 0, kind: input, shape index: {}]   ;;  %s1282_s1 = inlined_call_operand.vmem [shape: f32[32,8], index: 1, kind: input, shape index: {}]   ;;  %s1283_s2 = inlined_call_operand.vmem [shape: f32[1,8], index: 2, kind: input, shape index: {}]   ;;  %s1284_s3 = inlined_call_operand.vmem [shape: f32[8,8], index: 3, kind: input, shape index: {}]   ;;  %s1285_s4 = inlined_call_operand.vmem [shape: f32[1,8], index: 4, kind: input, shape index: {}]   ;;  %s1286_s5 = inlined_call_operand.vmem [shape: f32[8,32], index: 5, kind: input, shape index: {}]   ;;  %s1287_s6 = inlined_call_operand.vmem [shape: f32[1,32], index: 6, kind: input, shape index: {}]   ;;  %s1288_s7 = inlined_call_operand.hbm [shape: f32[2,1,32], index: 7, kind: output, shape index: {}]  }
   0x1   :  { %14 = vsyncpa [#allocation4 + $0x1], 0 }
   0x2   :  { %15 = vsyncpa [#allocation5], 0 }
   0x3   :  { %17 = vsyncpa [#allocation5 + $0x1], 0  ;;  %s1097_s24 = smov 0   ;;  %s1099_s25 = smov 0  }
   0x4   :  { %s1101_s26 = smov 0   ;;  %s1103_s27 = smov 0  }
   0x5   :  { %s1105_s28 = smov 0   ;;  %s1107_s29 = smov 0  }
   0x6 LB: > { %1291 = sst [smem:[#allocation9_spill]] %s1049_s28  ;;  %s851_s30 = sadd.s32 4294967295, %s1053_s29   ;;  %s1053_s29 = sphi %s1107_s29, %s23_s29   ;;  %s1049_s28 = sphi %s1105_s28, %s1298_s28   ;;  %s1045_s27 = sphi %s1103_s27, %s1297_s27   ;;  %s1041_s26 = sphi %s1101_s26, %s1301_s26   ;;  %s1037_s25 = sphi %s1099_s25, %s1300_s25   ;;  %s1033_s24 = sphi %s1097_s24, %s1299_s24  }
   0x7   : > { %s852_s8 = sadd.s32 4294967294, %s1053_s29   ;;  %s35_s9 = sadd.s32 1, %s1049_s28 }
   0x8   : > { %s44_s10 = sadd.s32 1, %s1041_s26  ;;  %p37_p0 = scmp.ge.s32.totalorder %s35_s9, 2 }
   0x9   : > { %p51_p1 = scmp.ne.s32.totalorder %s1041_s26, %s1037_s25  ;;  %p52_p2 = scmp.eq.s32.totalorder %s1053_s29, 0 }
   0xa   : > { %p57_p3 = scmp.ne.s32.totalorder %s1037_s25, %s1033_s24  ;;  %s1303_s9 = smov (%p37_p0, %s35_s9), 0 }
   0xb   : > { %1292 = sst [smem:[#allocation10_spill]] %s1303_s9  ;;  %p1138_p4 = por %p52_p2, %p51_p1 }
   0xc   : > { %p58_p5 = scmp.eq.s32.totalorder %s851_s30, 0  ;;  %s39_s12 = ssub.s32 %s1049_s28, %s1303_s9 }
   0xd   : > { %p207_p6 = scmp.eq.s32.totalorder %s851_s30, 1  ;;  %p42_p7 = scmp.eq.s32.totalorder %s39_s12, 0 }
   0xe   : > { %p1144_p8 = por %p58_p5, %p57_p3  ;;  %p213_p10 = scmp.eq.s32.totalorder %s852_s8, 1 }
   0xf   : > { %p1148_p9 = por %p207_p6, %p51_p1  ;;  %p854_p12 = scmp.ge.s32.totalorder %s1053_s29, 2 }
  0x10   : > { %s1153_s15 = scalar_select %p42_p7, %s1041_s26, %s44_s10  }
  0x11   : > { %p1155_p11 = por %p213_p10, %p57_p3  ;;  %p881_p13 = scmp.lt.s32.totalorder %s1053_s29, 2 }
  0x12   : > { %s251_s17 = sand.u32 1, %s1041_s26   ;;  %s868_s19 = sshll.u32 %s1049_s28, 8 }
  0x13   : > { %s855_s18 = sshll.u32 %s251_s17, 8  ;;  %s262_s22 = scalar_lea.hbm %s1281_s0, %s868_s19 }
  0x14   : > { %s255_s23 = scalar_lea.vmem [#allocation3], %s855_s18  ;;  %s263_s12 = sshll.u32 %s262_s22, 4  ;;  %s264_s12 = int_to_ptr.hbm [resolvable:$true] %s263_s12 }
  0x15   : > { %s265_s30 = sshll.u32 %s255_s23, 4  ;;  %p874_p0 = pnand %p881_p13, %p1138_p4  ;;  %s266_s30 = int_to_ptr.vmem [resolvable:$true] %s265_s30 }
  0x16   : > { %p858_p1 = scmp.ge.s32.totalorder %s1053_s29, 1  ;;  %s252_s8 = scalar_lea.sflag [#allocation4], %s251_s17 }
  0x17   : > { %s1055_s10 = smov 1024   ;;  %s1056_s9 = smov 64  }
  0x18   : > { %876 = dma.hbm_to_vmem [thread:$0]  (!%p874_p0), %s264_s12, 4096, %s266_s30, %s252_s8, %s1055_s10, %s1055_s10, %s1056_s9  }
  0x19   : > { %p273_p2 = scmp.lt.s32.totalorder %s1053_s29, 3 }
  0x1b   : > { %p274_p3 = pnand %p858_p1, %p273_p2 }
  0x1c   : > { %s1171_s28 = sand.u32 (!%p274_p3), 1, %s1037_s25  }
  0x1d   : > { %277 = sbr.rel (%p274_p3) target bundleno = 704 (0x2c0), region = 48  ;;  %s859_s18 = sshll.u32 (!%p274_p3), %s1171_s28, 8 }
  0x1e   : > { %s280_s19 = scalar_lea.sflag (!%p274_p3), [#allocation4], %s1171_s28  ;;  %s1175_s20 = scalar_lea.vmem (!%p274_p3), [#allocation3], %s859_s18 }
  0x22   : > { %1024 = dma.done.wait (%p1144_p8), %s280_s19, 4096  }
  0x23   : > { %1026 = vsyncadd (%p1144_p8), %s280_s19, 4294963200  ;;  %v351_v0 = vld [vmem:[%s1175_s20] sm:$0xff]  ;;  %v352_v1 = vld [vmem:[%s1175_s20 + $0x8] sm:$0xff]  ;;  %vm568_vm0 = vcmask 130112   ;;  %vm572_vm1 = vcmask 195712   ;;  %vm576_vm2 = vcmask 261312   ;;  %s770_s23 = scalar_lea.hbm %s1288_s7, %s1045_s27 }
  0x24   : > { %v353_v2 = vld [vmem:[%s1175_s20 + $0x10] sm:$0xff]  ;;  %v514_v3 = vadd.f32 %v352_v1, %v351_v0  ;;  %v354_v4 = vld [vmem:[%s1175_s20 + $0x18] sm:$0xff]  ;;  %v367_v5 = vld [vmem:[%s1175_s20 + $0x80] sm:$0xff]  ;;  %v563_v0 = vlaneseq  ;;  %vm578_vm3 = vcmask 261120   ;;  %vm647_vm8 = vcmask 64512   ;;  %s313_s30 = scalar_lea.vmem [#allocation6], %s1171_s28 }
  0x25   : > { %v368_v7 = vld [vmem:[%s1175_s20 + $0x88] sm:$0xff]  ;;  %v369_v8 = vld [vmem:[%s1175_s20 + $0x90] sm:$0xff]  ;;  %v355_v9 = vld [vmem:[%s1175_s20 + $0x20] sm:$0xff]  ;;  %s772_s12 = sshll.u32 %s313_s30, 4  ;;  %s774_s8 = sshll.u32 %s770_s23, 4  ;;  %s773_s12 = int_to_ptr.vmem [resolvable:$true] %s772_s12  ;;  %s775_s8 = int_to_ptr.hbm [resolvable:$true] %s774_s8 }
  0x26   : > { %v515_v6 = vadd.f32 %v514_v3, %v353_v2  ;;  %v532_v10 = vadd.f32 %v368_v7, %v367_v5  ;;  %v370_v12 = vld [vmem:[%s1175_s20 + $0x98] sm:$0xff]  ;;  %v359_v13 = vld [vmem:[%s1175_s20 + $0x40] sm:$0xff]  ;;  %v360_v14 = vld [vmem:[%s1175_s20 + $0x48] sm:$0xff]  ;;  %v564_v3 = vand.u32 127, %v563_v0  ;;  %s762_s27 = scalar_lea.sflag [#allocation5], %s1171_s28  ;;  %s985_s10 = sshra.s32 %s775_s8, 4  ;;  %s986_s10 = int_to_ptr.hbm [resolvable:$true] %s985_s10 }
  0x27   : > { %v356_v15 = vld [vmem:[%s1175_s20 + $0x28] sm:$0xff]  ;;  %v361_v17 = vld [vmem:[%s1175_s20 + $0x50] sm:$0xff]  ;;  %v523_v18 = vadd.f32 %v360_v14, %v359_v13  ;;  %v371_v21 = vld [vmem:[%s1175_s20 + $0xa0] sm:$0xff]  ;;  %s987_s18 = scalar_lea.hbm %s986_s10, 1  ;;  %s991_s9 = scalar_lea.hbm %s1288_s7, 2 }
  0x28   : > { %v516_v11 = vadd.f32 %v515_v6, %v354_v4  ;;  %v533_v16 = vadd.f32 %v532_v10, %v369_v8  ;;  %v357_v19 = vld [vmem:[%s1175_s20 + $0x30] sm:$0xff]  ;;  %v362_v22 = vld [vmem:[%s1175_s20 + $0x58] sm:$0xff]  ;;  %v375_v25 = vld [vmem:[%s1175_s20 + $0xc0] sm:$0xff]  ;;  %v566_v5 = vadd.s32 4294967288, %v564_v3  ;;  %v570_v6 = vadd.s32 4294967280, %v564_v3  ;;  %p988_p4 = scmp.ne.s32.totalorder %s986_s10, %s987_s18  ;;  %p992_p7 = scmp.lt.s32.totalorder %s986_s10, %s1288_s7 }
  0x29   : > { %v524_v24 = vadd.f32 %v523_v18, %v361_v17  ;;  %v376_v26 = vld [vmem:[%s1175_s20 + $0xc8] sm:$0xff]  ;;  %v377_v27 = vld [vmem:[%s1175_s20 + $0xd0] sm:$0xff]  ;;  %v363_v30 = vld [vmem:[%s1175_s20 + $0x60] sm:$0xff]  ;;  %v574_v10 = vadd.s32 4294967272, %v564_v3  ;;  %p993_p8 = scmp.lt.s32.totalorder %s991_s9, %s987_s18 }
  0x2a   : > { %v517_v20 = vadd.f32 %v516_v11, %v355_v9  ;;  %v534_v23 = vadd.f32 %v533_v16, %v370_v12  ;;  %v372_v29 = vld [vmem:[%s1175_s20 + $0xa8] sm:$0xff]  ;;  %v541_v31 = vadd.f32 %v376_v26, %v375_v25  ;;  %v358_v32 = vld [vmem:[%s1175_s20 + $0x38] sm:$0xff]  ;;  %v373_v37 = vld [vmem:[%s1175_s20 + $0xb0] sm:$0xff]  ;;  %p989_p5 = pnand %p988_p4, %p1148_p9 }
  0x2b   : > { %v525_v34 = vadd.f32 %v524_v24, %v362_v22  ;;  %v378_v35 = vld [vmem:[%s1175_s20 + $0xd8] sm:$0xff]  ;;  %v364_v38 = vld [vmem:[%s1175_s20 + $0x68] sm:$0xff]  ;;  %v379_v42 = vld [vmem:[%s1175_s20 + $0xe0] sm:$0xff]  ;;  %p994_p10 = por %p993_p8, %p992_p7 }
  0x2c   : > { %v518_v28 = vadd.f32 %v517_v20, %v356_v15  ;;  %v535_v33 = vadd.f32 %v534_v23, %v371_v21  ;;  %v542_v39 = vadd.f32 %v541_v31, %v377_v27  ;;  %v374_v44 = vld [vmem:[%s1175_s20 + $0xb8] sm:$0xff]  ;;  %v365_v45 = vld [vmem:[%s1175_s20 + $0x70] sm:$0xff]  ;;  %v380_v49 = vld [vmem:[%s1175_s20 + $0xe8] sm:$0xff]  ;;  %p990_p6 = pneg %p989_p5 }
  0x2d   : > { %v526_v41 = vadd.f32 %v525_v34, %v363_v30  ;;  %v366_v52 = vld [vmem:[%s1175_s20 + $0x78] sm:$0xff]  ;;  %v381_v54 = vld [vmem:[%s1175_s20 + $0xf0] sm:$0xff]  ;;  %v555_v62 = vld [vmem:[%s1282_s1 + $0x8] sm:$0xff] }
  0x2e   : > { %v519_v36 = vadd.f32 %v518_v28, %v357_v19  ;;  %v536_v40 = vadd.f32 %v535_v33, %v372_v29  ;;  %v543_v46 = vadd.f32 %v542_v39, %v378_v35  ;;  %v382_v57 = vld [vmem:[%s1175_s20 + $0xf8] sm:$0xff]  ;;  %v556_v61 = vld [vmem:[%s1282_s1 + $0x10] sm:$0xff]  ;;  %v554_v63 = vld [vmem:[%s1282_s1] sm:$0xff]  ;;  %p995_p13 = pnand %p994_p10, %p990_p6 }
  0x2f   : > { %v527_v48 = vadd.f32 %v526_v41, %v364_v38  ;;  %v557_v60 = vld [vmem:[%s1282_s1 + $0x18] sm:$0xff]  ;;  %v558_v20 = vld [vmem:[%s1283_s2] sm:$0x1] }
  0x30   : > { %v520_v43 = vadd.f32 %v519_v36, %v358_v32  ;;  %v537_v47 = vadd.f32 %v536_v40, %v373_v37  ;;  %v544_v50 = vadd.f32 %v543_v46, %v379_v42  ;;  %593 = vmatpush.msra.mxu0 %v557_v60  ;;  %v645_v32 = vld [vmem:[%s1284_s3] sm:$0xff] }
  0x31   : > { %v528_v53 = vadd.f32 %v527_v48, %v365_v45  ;;  %666 = vmatpush.msra.mxu1 %v645_v32 }
  0x32   : > { %521 = vadd.xlane.f32.xlu0 %v520_v43  ;;  %v538_v51 = vadd.f32 %v537_v47, %v374_v44  ;;  %v545_v55 = vadd.f32 %v544_v50, %v380_v49  ;;  %594 = vmatpush.msra.mxu0 %v556_v61 }
  0x33   : > { %v529_v56 = vadd.f32 %v528_v53, %v366_v52 }
  0x34   : > { %539 = vadd.xlane.f32.xlu1 %v538_v51  ;;  %v546_v58 = vadd.f32 %v545_v55, %v381_v54  ;;  %595 = vmatpush.msra.mxu0 %v555_v62 }
  0x36   : > { %v547_v59 = vadd.f32 %v546_v58, %v382_v57  ;;  %596 = vmatpush.msra.mxu0 %v554_v63  ;;  %v646_v63 = vld [vmem:[%s1285_s4] sm:$0x1] }
  0x3a   : > { %530 = vadd.xlane.f32.xlu0 %v529_v56 }
  0x3c   : > { %548 = vadd.xlane.f32.xlu1 %v547_v59 }
  0xa5   : > { %v522_v1 = vpop.xlane.xlu0 %521 }
  0xa6   : > { %v550_v4 = vmul.f32 0.0009765625, %v522_v1 }
  0xa7   : > { %v540_v2 = vpop.xlane.xlu1 %539 }
  0xa8   : > { %v552_v7 = vmul.f32 0.0009765625, %v540_v2  ;;  %v565_v11 = vperm.slane %v550_v4, %v564_v3 }
  0xaa   : > { %v571_v14 = vperm.slane %v552_v7, %v570_v6 }
  0xad   : > { %v531_v8 = vpop.xlane.xlu0 %530 }
  0xae   : > { %v551_v9 = vmul.f32 0.0009765625, %v531_v8 }
  0xaf   : > { %v549_v13 = vpop.xlane.xlu1 %548 }
  0xb0   : > { %v567_v12 = vperm.slane %v551_v9, %v566_v5  ;;  %v553_v15 = vmul.f32 0.0009765625, %v549_v13 }
  0xb2   : > { %v569_v16 = vsel %vm568_vm0, %v567_v12, %v565_v11  ;;  %v575_v17 = vperm.slane %v553_v15, %v574_v10  ;;  %v715_v11 = vld [vmem:[%s1286_s5] sm:$0xff]  ;;  %vm759_vm0 = vcmask 253952  }
  0xb3   : > { %v573_v18 = vsel %vm572_vm1, %v571_v14, %v569_v16  ;;  %735 = vmatpush.msra.mxu2 %v715_v11 }
  0xb4   : > { %v577_v19 = vsel %vm576_vm2, %v575_v17, %v573_v18 }
  0xb5   : > { %860 = vmatmul.msk.f32.vlgmr.msra.gmra.mxu0 %vm578_vm3, %v577_v19 }
 0x132   : > { %v598_v21 = vpop.f32.mrf.mxu0 }
 0x133   : > { %v599_v22 = vadd.f32 %v598_v21, %v558_v20 }
 0x135   : > { %v602_v23 = vmul.f32 0.70710677, %v599_v22  ;;  %v601_v60 = vmul.f32 0.5, %v599_v22 }
 0x137   : > { %v603_v24 = vmul.f32 %v602_v23, %v602_v23 }
 0x139   : > { %v604_v25 = vmin.f32 %v603_v24, 16.0 }
 0x13b   : > { %v605_v26 = vmul.f32 2.1237322e-06, %v604_v25  ;;  %v616_v27 = vmul.f32 3.8918573e-05, %v604_v25 }
 0x13d   : > { %v606_v28 = vadd.f32 0.00028619796, %v605_v26  ;;  %v617_v29 = vadd.f32 0.001143296, %v616_v27 }
 0x13f   : > { %v607_v30 = vmul.f32 %v606_v28, %v604_v25  ;;  %v618_v31 = vmul.f32 %v617_v29, %v604_v25 }
 0x141   : > { %v619_v33 = vadd.f32 0.014752088, %v618_v31  ;;  %v608_v34 = vadd.f32 0.0036580483, %v607_v30 }
 0x143   : > { %v620_v35 = vmul.f32 %v619_v33, %v604_v25  ;;  %v609_v37 = vmul.f32 %v608_v34, %v604_v25 }
 0x145   : > { %v621_v36 = vadd.f32 0.112945676, %v620_v35  ;;  %v610_v40 = vadd.f32 0.05243302, %v609_v37 }
 0x147   : > { %v622_v38 = vmul.f32 %v621_v36, %v604_v25  ;;  %v611_v43 = vmul.f32 %v610_v40, %v604_v25 }
 0x149   : > { %v623_v39 = vadd.f32 0.4994258, %v622_v38  ;;  %v612_v44 = vadd.f32 0.18741608, %v611_v43 }
 0x14b   : > { %v624_v41 = vmul.f32 %v623_v39, %v604_v25  ;;  %v613_v46 = vmul.f32 %v612_v44, %v604_v25 }
 0x14d   : > { %v625_v42 = vadd.f32 1.0, %v624_v41  ;;  %v614_v50 = vadd.f32 1.1283791, %v613_v46 }
 0x14f   : > { %933 = vrcp.f32 %v625_v42  ;;  %v637_v49 = vand.u32 2147483648, %v625_v42  ;;  %v635_v52 = vand.u32 2147483647, %v625_v42  ;;  %vm631_vm5 = vweird.f32 %v625_v42 }
 0x150   : > { %v615_v55 = vmul.f32 %v614_v50, %v602_v23 }
 0x151   : > { %v638_v54 = vor.u32 1.1754944e-38, %v637_v49  ;;  %vm636_vm7 = vcmp.eq.f32.partialorder %v635_v52, 8.507059e+37 }
 0x155   : > { %v934_v45 = vpop.eup %933 }
 0x156   : > { %v627_v47 = vmul.f32 %v934_v45, %v625_v42  ;;  %vm632_vm4 = vweird.f32 %v934_v45  ;;  %v716_v42 = vld [vmem:[%s1287_s6] sm:$0x1] }
 0x157   : > { %vm633_vm6 = vmor %vm631_vm5, %vm632_vm4 }
 0x158   : > { %v628_v48 = vsub.f32 1.0, %v627_v47 }
 0x15a   : > { %v629_v51 = vmul.f32 %v934_v45, %v628_v48 }
 0x15c   : > { %v630_v53 = vadd.f32 %v934_v45, %v629_v51 }
 0x15e   : > { %v634_v56 = vsel %vm633_vm6, %v934_v45, %v630_v53 }
 0x15f   : > { %v639_v57 = vsel %vm636_vm7, %v638_v54, %v634_v56 }
 0x160   : > { %v640_v58 = vmul.f32 %v639_v57, %v615_v55 }
 0x162   : > { %v861_v59 = vclamps-f32 %v640_v58, 1.0 }
 0x164   : > { %v643_v61 = vadd.f32 1.0, %v861_v59 }
 0x166   : > { %v644_v62 = vmul.f32 %v643_v61, %v601_v60 }
 0x168   : > { %862 = vmatmul.msk.f32.vlgmr.msra.gmra.mxu1 %vm647_vm8, %v644_v62 }
 0x1e5   : > { %v668_v0 = vpop.f32.mrf.mxu1 }
 0x1e6   : > { %v669_v1 = vadd.f32 %v668_v0, %v646_v63 }
 0x1e8   : > { %v672_v2 = vmul.f32 0.70710677, %v669_v1  ;;  %v671_v39 = vmul.f32 0.5, %v669_v1 }
 0x1ea   : > { %v673_v3 = vmul.f32 %v672_v2, %v672_v2 }
 0x1ec   : > { %v674_v4 = vmin.f32 %v673_v3, 16.0 }
 0x1ee   : > { %v675_v5 = vmul.f32 2.1237322e-06, %v674_v4  ;;  %v686_v6 = vmul.f32 3.8918573e-05, %v674_v4 }
 0x1f0   : > { %v676_v7 = vadd.f32 0.00028619796, %v675_v5  ;;  %v687_v8 = vadd.f32 0.001143296, %v686_v6 }
 0x1f2   : > { %v677_v9 = vmul.f32 %v676_v7, %v674_v4  ;;  %v688_v10 = vmul.f32 %v687_v8, %v674_v4 }
 0x1f4   : > { %v689_v12 = vadd.f32 0.014752088, %v688_v10  ;;  %v678_v13 = vadd.f32 0.0036580483, %v677_v9 }
 0x1f6   : > { %v690_v14 = vmul.f32 %v689_v12, %v674_v4  ;;  %v679_v16 = vmul.f32 %v678_v13, %v674_v4 }
 0x1f8   : > { %v691_v15 = vadd.f32 0.112945676, %v690_v14  ;;  %v680_v19 = vadd.f32 0.05243302, %v679_v16 }
 0x1fa   : > { %v692_v17 = vmul.f32 %v691_v15, %v674_v4  ;;  %v681_v22 = vmul.f32 %v680_v19, %v674_v4 }
 0x1fc   : > { %v693_v18 = vadd.f32 0.4994258, %v692_v17  ;;  %v682_v23 = vadd.f32 0.18741608, %v681_v22 }
 0x1fe   : > { %v694_v20 = vmul.f32 %v693_v18, %v674_v4  ;;  %v683_v25 = vmul.f32 %v682_v23, %v674_v4 }
 0x200   : > { %v695_v21 = vadd.f32 1.0, %v694_v20  ;;  %v684_v29 = vadd.f32 1.1283791, %v683_v25 }
 0x202   : > { %935 = vrcp.f32 %v695_v21  ;;  %v707_v28 = vand.u32 2147483648, %v695_v21  ;;  %v705_v31 = vand.u32 2147483647, %v695_v21  ;;  %vm701_vm10 = vweird.f32 %v695_v21 }
 0x203   : > { %v685_v34 = vmul.f32 %v684_v29, %v672_v2 }
 0x204   : > { %v708_v33 = vor.u32 1.1754944e-38, %v707_v28  ;;  %vm706_vm12 = vcmp.eq.f32.partialorder %v705_v31, 8.507059e+37 }
 0x208   : > { %v936_v24 = vpop.eup %935 }
 0x209   : > { %v697_v26 = vmul.f32 %v936_v24, %v695_v21  ;;  %vm702_vm9 = vweird.f32 %v936_v24 }
 0x20a   : > { %vm703_vm11 = vmor %vm701_vm10, %vm702_vm9 }
 0x20b   : > { %v698_v27 = vsub.f32 1.0, %v697_v26 }
 0x20d   : > { %v699_v30 = vmul.f32 %v936_v24, %v698_v27 }
 0x20f   : > { %v700_v32 = vadd.f32 %v936_v24, %v699_v30 }
 0x211   : > { %v704_v35 = vsel %vm703_vm11, %v936_v24, %v700_v32 }
 0x212   : > { %v709_v36 = vsel %vm706_vm12, %v708_v33, %v704_v35 }
 0x213   : > { %v710_v37 = vmul.f32 %v709_v36, %v685_v34 }
 0x215   : > { %v863_v38 = vclamps-f32 %v710_v37, 1.0 }
 0x217   : > { %v713_v40 = vadd.f32 1.0, %v863_v38 }
 0x219   : > { %v714_v41 = vmul.f32 %v713_v40, %v671_v39 }
 0x21b   : > { %864 = vmatmul.msk.f32.vlgmr.msra.gmra.mxu2 %vm647_vm8, %v714_v41 }
 0x29e   : > { %v737_v43 = vpop.f32.mrf.mxu2 }
 0x29f   : > { %v738_v44 = vadd.f32 %v737_v43, %v716_v42 }
 0x2a1   : > { %v865_v45 = vmul.f32 -1.442695, %v738_v44 }
 0x2a3   : > { %937 = vpow2.f32 %v865_v45 }
 0x2a9   : > { %v938_v46 = vpop.eup %937 }
 0x2aa   : > { %v743_v47 = vadd.f32 1.0, %v938_v46 }
 0x2ac   : > { %939 = vrcp.f32 %v743_v47  ;;  %v755_v51 = vand.u32 2147483648, %v743_v47  ;;  %v753_v53 = vand.u32 2147483647, %v743_v47  ;;  %vm749_vm14 = vweird.f32 %v743_v47 }
 0x2ae   : > { %v756_v55 = vor.u32 1.1754944e-38, %v755_v51  ;;  %vm754_vm1 = vcmp.eq.f32.partialorder %v753_v53, 8.507059e+37 }
 0x2b2   : > { %v940_v48 = vpop.eup %939 }
 0x2b3   : > { %v745_v49 = vmul.f32 %v940_v48, %v743_v47  ;;  %vm750_vm13 = vweird.f32 %v940_v48 }
 0x2b4   : > { %vm751_vm15 = vmor %vm749_vm14, %vm750_vm13 }
 0x2b5   : > { %v746_v50 = vsub.f32 1.0, %v745_v49 }
 0x2b7   : > { %v747_v52 = vmul.f32 %v940_v48, %v746_v50 }
 0x2b9   : > { %v748_v54 = vadd.f32 %v940_v48, %v747_v52 }
 0x2bb   : > { %v752_v56 = vsel %vm751_vm15, %v940_v48, %v748_v54 }
 0x2bc   : > { %v757_v57 = vsel %vm754_vm1, %v756_v55, %v752_v56 }
 0x2bd   : > { %760 = vst.msk [vmem:[%s313_s30] sm:$0x1] %vm759_vm0, %v757_v57 }
 0x2be   : > { %998 = shalt.err (!%p995_p13)
}
 0x2bf   : > { %871 = dma.vmem_to_hbm [thread:$0]  (%p1148_p9), %s773_s12, 16, %s775_s8, %s762_s27  }
 0x2c0 PF: > { %s786_s28 = sand.u32 1, %s1033_s24   ;;  %p878_p0 = pnand %p854_p12, %p1155_p11 }
 0x2c1   : > { %s787_s17 = scalar_lea.sflag [#allocation5], %s786_s28 }
 0x2c2   : > { %p879_p1 = pneg %p878_p0 }
 0x2c4   : > { %1028 = dma.done.wait (%p879_p1), %s787_s17, 16  }
 0x2c5   : > { %1030 = vsyncadd (%p879_p1), %s787_s17, 4294967280  ;;  %s23_s29 = sadd.s32 1, %s1053_s29   ;;  %s1297_s27 = sld [smem:[#allocation9_spill]] }
 0x2c6   : > { %p20_p2 = scmp.ge.s32.totalorder %s23_s29, 4   ;;  %s1298_s28 = sld [smem:[#allocation10_spill]] }
 0x2c7   : > { %s1299_s24 = smov %s1037_s25  ;;  %s1300_s25 = smov %s1041_s26 }
 0x2c8   : > { %s1301_s26 = smov %s1153_s15  ;;  %22 = sbr.rel (!%p20_p2) target bundleno = 6 (0x6), region = 101 }
 0x2cd   :  { %792 = vsyncpa [#allocation4], 1 }
 0x2ce   :  { %794 = vsyncpa [#allocation4 + $0x1], 1 }
 0x2cf   :  { %795 = vsyncpa [#allocation5], 1 }
 0x2d0   :  { %797 = vsyncpa [#allocation5 + $0x1], 1 }

</bundles_post_ra>
